<compile_context>
chip_gen: v7x
topology: tpu7x:2x2x1
jax: 0.10.0
libtpu: 0.0.40
codegen_flags: <defaults>
</compile_context>

<pallas_src>
import functools

import jax
import jax.numpy as jnp
from jax import lax
from jax.experimental import pallas as pl
from jax.experimental.pallas import tpu as pltpu


_TILE_N_MAX = 2048  # ~6 MiB double-buffered bf16 x at H=768; fits the 32 MiB
                    # scoped-VMEM budget on v5e/v6e and v7x (64 MiB physical).
_T_PAD = 128        # MXU-width tag dim for the matmul (real num_tags is 3/9)


def _round_up(a, m):
    return (a + m - 1) // m * m


def _ranker_kernel(x_ref, w_ref, b_ref, gold_ref, mask_ref,
                   logits_ref, tags_ref, nll_ref, *, num_tags):
    # x:    (TN, H)   bf16  flattened raw_ctxt_encoding tile
    # w:    (H, TP)   bf16  tagger weight, tag dim zero-padded to TP=128
    # b:    (1, TP)   f32   tagger bias, zero-padded
    # gold: (TN, 1)   i32   golden tags
    # mask: (TN, 1)   f32   attention mask (0/1)
    # outs: logits (TN, num_tags) f32, tags (TN, 1) i32, nll (TN, 1) f32
    x = x_ref[...].astype(jnp.bfloat16)   # no-op if already bf16
    w = w_ref[...]
    b = b_ref[...]

    # --- LongTagger: logits = Linear(raw_ctxt_encoding) ------------------
    # bf16 operands on the MXU, f32 accumulation, MXU-width (TN, 128) tile.
    logits = jnp.dot(x, w, preferred_element_type=jnp.float32) + b   # (TN,TP)
    # Narrow f32 writeback: 12 B/row instead of a 512 B/row padded slab.
    logits_ref[...] = logits[:, :num_tags]

    tp = logits.shape[-1]
    col = lax.broadcasted_iota(jnp.int32, logits.shape, 1)            # (TN,TP)
    neg = jnp.float32(-1e30)
    masked = jnp.where(col < num_tags, logits, neg)   # padded tag cols inert

    # --- tags = argmax(logits, axis=-1)  (first-max tie break, like torch)
    max_val = jnp.max(masked, axis=-1, keepdims=True)                 # (TN,1)
    cand = jnp.where(masked == max_val, col, tp)                      # (TN,TP)
    tags_ref[...] = jnp.min(cand, axis=-1, keepdims=True).astype(jnp.int32)

    # --- score_tagger: masked per-row NLL, reduced in the wrapper so the
    # grid axis stays fully parallel (shards across TensorCores on v7x).
    gold = gold_ref[...]                                              # (TN,1)
    mask = mask_ref[...]                                              # (TN,1)
    lse = jnp.log(jnp.sum(jnp.exp(masked - max_val),
                          axis=-1, keepdims=True)) + max_val          # (TN,1)
    tgt = jnp.sum(jnp.where(col == gold, logits, 0.0),
                  axis=-1, keepdims=True)                             # (TN,1)
    nll_ref[...] = (lse - tgt) * mask                                 # (TN,1)


def _tagger_and_loss(x, w_pad, b_pad, gold, mask, *, num_tags, tile_n):
    n_pad, h = x.shape
    t_pad = w_pad.shape[1]
    num_tiles = n_pad // tile_n

    grid_spec = pltpu.PrefetchScalarGridSpec(
        num_scalar_prefetch=0,
        grid=(num_tiles,),
        in_specs=[
            pl.BlockSpec((tile_n, h), lambda i: (i, 0)),     # x tile (bf16)
            pl.BlockSpec((h, t_pad), lambda i: (0, 0)),      # W (resident)
            pl.BlockSpec((1, t_pad), lambda i: (0, 0)),      # b (resident)
            pl.BlockSpec((tile_n, 1), lambda i: (i, 0)),     # golden tags
            pl.BlockSpec((tile_n, 1), lambda i: (i, 0)),     # mask
        ],
        out_specs=[
            # Narrow logits: last dim == full array extent, so the (8,128)
            # divisibility rule is satisfied; masked 3-lane stores are cheap
            # next to the dominant x DMA stream.
            pl.BlockSpec((tile_n, num_tags), lambda i: (i, 0)),
            pl.BlockSpec((tile_n, 1), lambda i: (i, 0)),      # tags
            pl.BlockSpec((tile_n, 1), lambda i: (i, 0)),      # per-row NLL
        ],
    )
    return pl.pallas_call(
        functools.partial(_ranker_kernel, num_tags=num_tags),
        grid_spec=grid_spec,
        out_shape=(
            jax.ShapeDtypeStruct((n_pad, num_tags), jnp.float32),
            jax.ShapeDtypeStruct((n_pad, 1), jnp.int32),
            jax.ShapeDtypeStruct((n_pad, 1), jnp.float32),
        ),
        compiler_params=pltpu.CompilerParams(
            dimension_semantics=("parallel",),
            vmem_limit_bytes=32 * 1024 * 1024,
        ),
    )(x, w_pad, b_pad, gold, mask)


def long_encoder_ranker_forward(token_idx_ctxt, mask_ctxt, golden_tags,
                                emb_table, tagger_w, tagger_b,
                                compute_dtype=jnp.bfloat16):
    """Mirrors LongEncoderRanker.forward with is_biencoder=False.

    Returns (loss, ctxt_tags, ctxt_logits).
    """
    B, S = token_idx_ctxt.shape
    H = emb_table.shape[1]
    T = tagger_w.shape[1]
    assert T <= _T_PAD

    N = B * S
    tile_n = min(_TILE_N_MAX, _round_up(N, 8))
    n_pad = _round_up(N, tile_n)

    # TODO(synk): the pretrained allenai/longformer-base-4096 encoder has no
    # in-script Pallas equivalent; raw_ctxt_encoding is a deterministic
    # embedding lookup.  The gather reads a bf16-cast table and writes the
    # already-padded bf16 slab directly (single materialization of the (N,H)
    # activation — no astype / pad round trips).  Fully fusing the gather
    # into the kernel (scalar-prefetched token ids + per-row HBM DMA) would
    # remove this last (N,H) HBM round trip.
    tok = token_idx_ctxt.reshape(N).astype(jnp.int32)
    if n_pad != N:
        tok = jnp.pad(tok, (0, n_pad - N))            # padded rows → id 0
    x = jnp.take(emb_table.astype(compute_dtype), tok, axis=0)   # (n_pad,H)

    gold = golden_tags.reshape(N, 1).astype(jnp.int32)
    mask = mask_ctxt.reshape(N, 1).astype(jnp.float32)
    if n_pad != N:
        pad = n_pad - N
        gold = jnp.pad(gold, ((0, pad), (0, 0)))
        mask = jnp.pad(mask, ((0, pad), (0, 0)))      # padded rows: mask=0

    w_pad = jnp.pad(tagger_w, ((0, 0), (0, _T_PAD - T))).astype(compute_dtype)
    b_pad = jnp.pad(tagger_b, ((0, 0), (0, _T_PAD - T))).astype(jnp.float32)

    logits_flat, tags_flat, nll_flat = _tagger_and_loss(
        x, w_pad, b_pad, gold, mask, num_tags=T, tile_n=tile_n)

    ctxt_logits = logits_flat[:N].reshape(B, S, T)
    ctxt_tags = tags_flat[:N, 0].reshape(B, S)
    # Masked rows (and grid-padding rows) carry nll=0, so sum over everything.
    total = jnp.sum(nll_flat[:, 0])
    count = jnp.sum(mask_ctxt.astype(jnp.float32))
    loss = total / jnp.maximum(count, 1.0)   # guard fully-masked batch
    return loss, ctxt_tags, ctxt_logits


def _reference(token_idx_ctxt, mask_ctxt, golden_tags, emb, w, b,
               compute_dtype=jnp.bfloat16):
    raw = jnp.take(emb, token_idx_ctxt, axis=0)
    logits = jnp.dot(raw.astype(compute_dtype), w.astype(compute_dtype),
                     preferred_element_type=jnp.float32) + b[0]
    tags = jnp.argmax(logits, axis=2)
    m = mask_ctxt.astype(jnp.float32)
    logp = jax.nn.log_softmax(logits, axis=-1)
    nll = -jnp.take_along_axis(logp, golden_tags[..., None], axis=-1)[..., 0]
    loss = jnp.sum(nll * m) / jnp.sum(m)
    return loss, tags, logits


if __name__ == "__main__":
    B, S, H, VOCAB = 2, 8, 32, 50
    NUM_TAGS = 3  # params['conll'] = False

    key = jax.random.PRNGKey(0)
    k_emb, k_w, k_b, k_tok, k_tag = jax.random.split(key, 5)

    # Deterministic parameter init (synthetic; no checkpoint load).
    emb_table = 0.02 * jax.random.normal(k_emb, (VOCAB, H), jnp.float32)
    tagger_w = 0.02 * jax.random.normal(k_w, (H, NUM_TAGS), jnp.float32)
    tagger_b = 0.02 * jax.random.normal(k_b, (1, NUM_TAGS), jnp.float32)

    # Inputs.
    token_idx_ctxt = jax.random.randint(k_tok, (B, S), 1, VOCAB, jnp.int32)
    golden_tags = jax.random.randint(k_tag, (B, S), 0, NUM_TAGS, jnp.int32)
    lengths = jnp.array([8, 5], dtype=jnp.int32)
    mask_ctxt = (jnp.arange(S, dtype=jnp.int32)[None, :] < lengths[:, None])

    loss, ctxt_tags, ctxt_logits = long_encoder_ranker_forward(
        token_idx_ctxt, mask_ctxt, golden_tags, emb_table, tagger_w, tagger_b)
    jax.block_until_ready((loss, ctxt_tags, ctxt_logits))

    # Sanity check against a pure-JAX reference (same bf16 operand path).
    ref_loss, ref_tags, ref_logits = _reference(
        token_idx_ctxt, mask_ctxt, golden_tags, emb_table, tagger_w, tagger_b)
    assert jnp.allclose(loss, ref_loss, rtol=1e-4, atol=1e-4)
    assert jnp.allclose(ctxt_logits, ref_logits, rtol=1e-4, atol=1e-4)
    assert jnp.all(ctxt_tags == ref_tags.astype(jnp.int32))

    print("KERNEL_OK")
</pallas_src>

<mosaic_0001>
module attributes {stable_mosaic.version = 11 : i64} {
  func.func @_ranker_kernel(%arg0: i32, %arg1: memref<16x32xbf16, #tpu.memory_space<vmem>>, %arg2: memref<32x128xbf16, #tpu.memory_space<vmem>>, %arg3: memref<1x128xf32, #tpu.memory_space<vmem>>, %arg4: memref<16x1xi32, #tpu.memory_space<vmem>>, %arg5: memref<16x1xf32, #tpu.memory_space<vmem>>, %arg6: memref<16x3xf32, #tpu.memory_space<vmem>>, %arg7: memref<16x1xi32, #tpu.memory_space<vmem>>, %arg8: memref<16x1xf32, #tpu.memory_space<vmem>>) attributes {dimension_semantics = [#tpu.dimension_semantics<parallel>], iteration_bounds = array<i64: 1>, scalar_prefetch = 0 : i64, scratch_operands = 0 : i64, tpu.core_type = #tpu.core_type<tc>, window_params = [{transform_indices = @transform_0, window_bounds = array<i64: 16, 32>}, {pipeline_mode = #tpu.pipeline_mode<synchronous>, transform_indices = @transform_1, window_bounds = array<i64: 32, 128>}, {pipeline_mode = #tpu.pipeline_mode<synchronous>, transform_indices = @transform_2, window_bounds = array<i64: 1, 128>}, {transform_indices = @transform_3, window_bounds = array<i64: 16, 1>}, {transform_indices = @transform_4, window_bounds = array<i64: 16, 1>}, {transform_indices = @transform_5, window_bounds = array<i64: 16, 3>}, {transform_indices = @transform_6, window_bounds = array<i64: 16, 1>}, {transform_indices = @transform_7, window_bounds = array<i64: 16, 1>}]} {
    %c0 = arith.constant 0 : index
    %c0_0 = arith.constant 0 : index
    %0 = vector.load %arg1[%c0, %c0_0] : memref<16x32xbf16, #tpu.memory_space<vmem>>, vector<16x32xbf16>
    %c0_1 = arith.constant 0 : index
    %c0_2 = arith.constant 0 : index
    %1 = vector.load %arg2[%c0_1, %c0_2] : memref<32x128xbf16, #tpu.memory_space<vmem>>, vector<32x128xbf16>
    %c0_3 = arith.constant 0 : index
    %c0_4 = arith.constant 0 : index
    %2 = vector.load %arg3[%c0_3, %c0_4] : memref<1x128xf32, #tpu.memory_space<vmem>>, vector<1x128xf32>
    %cst = arith.constant dense<0.000000e+00> : vector<16x128xf32>
    %3 = tpu.matmul %0, %1, %cst {dimension_numbers = #tpu.dot_dimension_numbers<[1], [0], [0], [1], [0, 0, 1, 1], [], []>} : vector<16x32xbf16>, vector<32x128xbf16>, vector<16x128xf32> -> vector<16x128xf32>
    %4 = vector.broadcast %2 : vector<1x128xf32> to vector<16x128xf32>
    %5 = arith.addf %3, %4 : vector<16x128xf32>
    %6 = vector.extract_strided_slice %5 {offsets = [0, 0], sizes = [16, 3], strides = [1, 1]} : vector<16x128xf32> to vector<16x3xf32>
    %c0_5 = arith.constant 0 : index
    %c0_6 = arith.constant 0 : index
    %7 = vector.load %arg6[%c0_5, %c0_6] : memref<16x3xf32, #tpu.memory_space<vmem>>, vector<16x3xf32>
    tpu.vector_store %arg6[%c0_5, %c0_6], %6 {strides = array<i32>} : memref<16x3xf32, #tpu.memory_space<vmem>>, vector<16x3xf32>,
    %8 = tpu.iota {dimensions = array<i32: 1>} : vector<16x128xi32>
    %c3_i32 = arith.constant 3 : i32
    %9 = vector.broadcast %c3_i32 : i32 to vector<16x128xi32>
    %10 = arith.cmpi slt, %8, %9 : vector<16x128xi32>
    %cst_7 = arith.constant -1.000000e+30 : f32
    %11 = vector.broadcast %cst_7 : f32 to vector<16x128xf32>
    %12 = arith.select %10, %5, %11 : vector<16x128xi1>, vector<16x128xf32>
    %cst_8 = arith.constant dense<0xFF800000> : vector<16xf32>
    %13 = vector.multi_reduction <maximumf>, %12, %cst_8 [1] : vector<16x128xf32> to vector<16xf32>
    %14 = vector.shape_cast %13 : vector<16xf32> to vector<16x1xf32>
    %15 = vector.broadcast %14 : vector<16x1xf32> to vector<16x128xf32>
    %16 = arith.cmpf oeq, %12, %15 : vector<16x128xf32>
    %c128_i32 = arith.constant 128 : i32
    %17 = vector.broadcast %c128_i32 : i32 to vector<16x128xi32>
    %18 = arith.select %16, %8, %17 : vector<16x128xi1>, vector<16x128xi32>
    %cst_9 = arith.constant dense<2147483647> : vector<16xi32>
    %19 = vector.multi_reduction <minsi>, %18, %cst_9 [1] : vector<16x128xi32> to vector<16xi32>
    %20 = vector.shape_cast %19 : vector<16xi32> to vector<16x1xi32>
    %c0_10 = arith.constant 0 : index
    %c0_11 = arith.constant 0 : index
    %21 = vector.load %arg7[%c0_10, %c0_11] : memref<16x1xi32, #tpu.memory_space<vmem>>, vector<16x1xi32>
    tpu.vector_store %arg7[%c0_10, %c0_11], %20 {strides = array<i32>} : memref<16x1xi32, #tpu.memory_space<vmem>>, vector<16x1xi32>,
    %c0_12 = arith.constant 0 : index
    %c0_13 = arith.constant 0 : index
    %22 = vector.load %arg4[%c0_12, %c0_13] : memref<16x1xi32, #tpu.memory_space<vmem>>, vector<16x1xi32>
    %c0_14 = arith.constant 0 : index
    %c0_15 = arith.constant 0 : index
    %23 = vector.load %arg5[%c0_14, %c0_15] : memref<16x1xf32, #tpu.memory_space<vmem>>, vector<16x1xf32>
    %24 = vector.broadcast %14 : vector<16x1xf32> to vector<16x128xf32>
    %25 = arith.subf %12, %24 : vector<16x128xf32>
    %26 = math.exp %25 : vector<16x128xf32>
    %cst_16 = arith.constant dense<0.000000e+00> : vector<16xf32>
    %27 = vector.multi_reduction <add>, %26, %cst_16 [1] : vector<16x128xf32> to vector<16xf32>
    %28 = vector.shape_cast %27 : vector<16xf32> to vector<16x1xf32>
    %29 = math.log %28 : vector<16x1xf32>
    %30 = arith.addf %29, %14 : vector<16x1xf32>
    %31 = vector.broadcast %22 : vector<16x1xi32> to vector<16x128xi32>
    %32 = arith.cmpi eq, %8, %31 : vector<16x128xi32>
    %cst_17 = arith.constant 0.000000e+00 : f32
    %33 = vector.broadcast %cst_17 : f32 to vector<16x128xf32>
    %34 = arith.select %32, %5, %33 : vector<16x128xi1>, vector<16x128xf32>
    %cst_18 = arith.constant dense<0.000000e+00> : vector<16xf32>
    %35 = vector.multi_reduction <add>, %34, %cst_18 [1] : vector<16x128xf32> to vector<16xf32>
    %36 = vector.shape_cast %35 : vector<16xf32> to vector<16x1xf32>
    %37 = arith.subf %30, %36 : vector<16x1xf32>
    %38 = arith.mulf %37, %23 : vector<16x1xf32>
    %c0_19 = arith.constant 0 : index
    %c0_20 = arith.constant 0 : index
    %39 = vector.load %arg8[%c0_19, %c0_20] : memref<16x1xf32, #tpu.memory_space<vmem>>, vector<16x1xf32>
    tpu.vector_store %arg8[%c0_19, %c0_20], %38 {strides = array<i32>} : memref<16x1xf32, #tpu.memory_space<vmem>>, vector<16x1xf32>,
    return
  }
  func.func @transform_0(%arg0: i32) -> (i32, i32) {
    %c0_i32 = arith.constant 0 : i32
    %c0_i32_0 = arith.constant 0 : i32
    return %arg0, %c0_i32 : i32, i32
  }
  func.func @transform_1(%arg0: i32) -> (i32, i32) {
    %c0_i32 = arith.constant 0 : i32
    %c0_i32_0 = arith.constant 0 : i32
    %c0_i32_1 = arith.constant 0 : i32
    return %c0_i32, %c0_i32_0 : i32, i32
  }
  func.func @transform_2(%arg0: i32) -> (i32, i32) {
    %c0_i32 = arith.constant 0 : i32
    %c0_i32_0 = arith.constant 0 : i32
    %c0_i32_1 = arith.constant 0 : i32
    return %c0_i32, %c0_i32_0 : i32, i32
  }
  func.func @transform_3(%arg0: i32) -> (i32, i32) {
    %c0_i32 = arith.constant 0 : i32
    %c0_i32_0 = arith.constant 0 : i32
    return %arg0, %c0_i32 : i32, i32
  }
  func.func @transform_4(%arg0: i32) -> (i32, i32) {
    %c0_i32 = arith.constant 0 : i32
    %c0_i32_0 = arith.constant 0 : i32
    return %arg0, %c0_i32 : i32, i32
  }
  func.func @transform_5(%arg0: i32) -> (i32, i32) {
    %c0_i32 = arith.constant 0 : i32
    %c0_i32_0 = arith.constant 0 : i32
    return %arg0, %c0_i32 : i32, i32
  }
  func.func @transform_6(%arg0: i32) -> (i32, i32) {
    %c0_i32 = arith.constant 0 : i32
    %c0_i32_0 = arith.constant 0 : i32
    return %arg0, %c0_i32 : i32, i32
  }
  func.func @transform_7(%arg0: i32) -> (i32, i32) {
    %c0_i32 = arith.constant 0 : i32
    %c0_i32_0 = arith.constant 0 : i32
    return %arg0, %c0_i32 : i32, i32
  }
}

</mosaic_0001>

<bundles_post_ra>
// kernel: tpu_custom_call.1
= control target key start
LH: loop header
LB: loop body
LE: loop exit
PB: predicated region body
PF: predicated region fallthrough
CT: control target
= control target key end

     0   :  { %v230_v0 = vmov 0.0   ;;  %vm231_vm0 = vmmov 0   ;;  %vm54_vm1 = vcmask 261120   ;;  %v232_v4 = vmov 0   ;;  %s331_s1 = inlined_call_operand.vmem [shape: bf16[32,128], index: 1, kind: input, shape index: {}]   ;;  %s332_s0 = inlined_call_operand.vmem [shape: bf16[16,32], index: 0, kind: input, shape index: {}]   ;;  %s333_s2 = inlined_call_operand.vmem [shape: f32[1,128], index: 2, kind: input, shape index: {}]   ;;  %s334_s5 = inlined_call_operand.vmem [shape: f32[16,3], index: 5, kind: output, shape index: {0}]   ;;  %s335_s3 = inlined_call_operand.vmem [shape: s32[16,1], index: 3, kind: input, shape index: {}]   ;;  %s336_s4 = inlined_call_operand.vmem [shape: f32[16,1], index: 4, kind: input, shape index: {}]   ;;  %s337_s7 = inlined_call_operand.vmem [shape: f32[16,1], index: 7, kind: output, shape index: {2}]   ;;  %s338_s6 = inlined_call_operand.vmem [shape: s32[16,1], index: 6, kind: output, shape index: {1}]  }
   0x1   :  { %206 = vmatprep.subr.bf16.mxu0 %v230_v0  ;;  %v219_v1 = vld [vmem:[%s331_s1] sm:$0xff]   ;;  %210 = vmatprep.mubr.msk.bf16.mxu0 %vm231_vm0, %v230_v0  ;;  %v220_v2 = vld [vmem:[%s331_s1 + $0x8] sm:$0xff]   ;;  %v102_v5 = vlaneseq  ;;  %vm99_vm2 = vcmask 23552   ;;  %vm143_vm10 = vcmask 7168  }
   0x2   :  { %207 = vmatpush3.bf16.msra.mxu0 %v219_v1  ;;  %v221_v3 = vld [vmem:[%s332_s0] sm:$0xff]   ;;  %217 = vset.pattern.permute.xlu0 %v232_v4  ;;  %v147_v28 = vld [vmem:[%s335_s3 + $0x8] sm:$0xff] }
   0x3   :  { %208 = vmatprep.subr.bf16.mxu0 %v230_v0  ;;  %218 = vset.pattern.permute.xlu1 %v232_v4  ;;  %v282_v6 = vand.u32 127, %v102_v5  ;;  %v198_v7 = vld [vmem:[%s333_s2] ss:$0 sm:$0xff] }
   0x4   :  { %v146_v16 = vld [vmem:[%s335_s3] sm:$0xff] }
   0x5   :  { %vm104_vm3 = vcmp.lt.s32.totalorder %v282_v6, 3  ;;  %v148_v48 = vld [vmem:[%s336_s4] sm:$0xff] }
   0x6   :  { %209 = vmatpush3.bf16.msra.mxu0 %v220_v2  ;;  %v149_v2 = vld [vmem:[%s336_s4 + $0x8] sm:$0xff] }
   0x9   :  { %211 = vmatmul.mubr.msk.bf16.vlgmr.msra.gmra.mrb[0].mxu0 %vm54_vm1, %v221_v3 }
  0xdc   :  { %v92_v8 = vpop.f32.mrb[0].mxu0 }
  0xdd   :  { %v93_v9 = vadd.f32 %v198_v7, %v92_v8  ;;  %v212_v10 = vpop.f32.mrb[1].mxu0 }
  0xde   :  { %v95_v11 = vpop.f32.mrb[2].mxu0 }
  0xdf   :  { %100 = vst.msk [vmem:[%s334_s5] sm:$0xff] %vm99_vm2, %v93_v9  ;;  %v96_v12 = vadd.f32 %v198_v7, %v95_v11  ;;  %v213_v13 = vpop.f32.mrb[3].mxu0  ;;  %v105_v14 = vsel %vm104_vm3, %v93_v9, -1e+30 }
  0xe0   :  { %107 = vmax.xlane.f32.xlu0 %v105_v14 }
  0xe1   :  { %101 = vst.msk [vmem:[%s334_s5 + $0x8] sm:$0xff] %vm99_vm2, %v96_v12  ;;  %v106_v15 = vsel %vm104_vm3, %v96_v12, -1e+30 }
  0xe4   :  { %109 = vmax.xlane.f32.xlu0 %v106_v15 }
  0xfa   :  { %167 = vperm.xlu0 %217, %v146_v16  }
 0x16d   :  { %v108_v17 = vpop.xlane.xlu0 %107 }
 0x16e   :  { %vm111_vm4 = vcmp.eq.f32.partialorder %v105_v14, %v108_v17  ;;  %v150_v29 = vsub.f32 %v105_v14, %v108_v17 }
 0x16f   :  { %v113_v18 = vsel %vm111_vm4, %v282_v6, 128 }
 0x170   :  { %v116_v19 = vshra.s32 %v113_v18, 16  ;;  %v152_v30 = vmul.f32 1.442695, %v150_v29  ;;  %v115_v34 = vand.u32 65535, %v113_v18 }
 0x171   :  { %v298_v20 = vpop.xlane.xlu0 %109 }
 0x172   :  { %vm112_vm5 = vcmp.eq.f32.partialorder %v106_v15, %v298_v20  ;;  %v151_v21 = vsub.f32 %v106_v15, %v298_v20  ;;  %v118_v22 = vcvt.s32.f32 %v116_v19  ;;  %v117_v36 = vcvt.s32.f32 %v115_v34 }
 0x173   :  { %v114_v23 = vsel %vm112_vm5, %v282_v6, 128 }
 0x174   :  { %v154_v24 = vmul.f32 1.442695, %v151_v21  ;;  %119 = vmin.xlane.f32.xlu1 %v118_v22  ;;  %v130_v25 = vshra.s32 %v114_v23, 16  ;;  %v129_v37 = vand.u32 65535, %v114_v23 }
 0x176   :  { %222 = vpow2.f32 %v154_v24  ;;  %v132_v26 = vcvt.s32.f32 %v130_v25  ;;  %v131_v40 = vcvt.s32.f32 %v129_v37 }
 0x177   :  { %224 = vpow2.f32 %v152_v30 }
 0x178   :  { %133 = vmin.xlane.f32.xlu1 %v132_v26 }
 0x179   :  { %v168_v31 = vpop.permute.xlu0 %167 }
 0x17a   :  { %vm172_vm6 = vcmp.eq.s32.totalorder %v282_v6, %v168_v31 }
 0x17b   :  { %v174_v33 = vsel %vm172_vm6, %v93_v9, 0.0 }
 0x180   :  { %v223_v27 = vpop.eup %222 }
 0x181   :  { %158 = vadd.xlane.f32.xlu0 %v223_v27  ;;  %v225_v32 = vpop.eup %224 }
 0x189   :  { %170 = vperm.xlu1 %218, %v147_v28  }
 0x1ad   :  { %156 = vadd.xlane.f32.xlu1 %v225_v32 }
 0x1b1   :  { %176 = vadd.xlane.f32.xlu1 %v174_v33 }
 0x201   :  { %v120_v35 = vpop.xlane.xlu1 %119 }
 0x202   :  { %vm121_vm7 = vcmp.eq.f32.partialorder %v118_v22, %v120_v35  ;;  %v126_v53 = vcvt.f32.s32 %v120_v35 }
 0x203   :  { %v122_v38 = vsel %vm121_vm7, %v117_v36, inf }
 0x204   :  { %123 = vmin.xlane.f32.xlu1 %v122_v38  ;;  %v127_v56 = vshll.u32 %v126_v53, 16 }
 0x205   :  { %v134_v39 = vpop.xlane.xlu1 %133 }
 0x206   :  { %vm135_vm8 = vcmp.eq.f32.partialorder %v132_v26, %v134_v39  ;;  %v140_v57 = vcvt.f32.s32 %v134_v39 }
 0x207   :  { %v136_v41 = vsel %vm135_vm8, %v131_v40, inf }
 0x208   :  { %137 = vmin.xlane.f32.xlu1 %v136_v41  ;;  %v141_v62 = vshll.u32 %v140_v57, 16 }
 0x209   :  { %v171_v42 = vpop.permute.xlu1 %170 }
 0x20a   :  { %vm173_vm9 = vcmp.eq.s32.totalorder %v282_v6, %v171_v42 }
 0x20b   :  { %v175_v43 = vsel %vm173_vm9, %v96_v12, 0.0 }
 0x20c   :  { %178 = vadd.xlane.f32.xlu1 %v175_v43 }
 0x20e   :  { %v159_v52 = vpop.xlane.xlu0 %158 }
 0x23a   :  { %v157_v44 = vpop.xlane.xlu1 %156 }
 0x23b   :  { %226 = vlog2.f32 %v157_v44 }
 0x23c   :  { %228 = vlog2.f32 %v159_v52 }
 0x23e   :  { %v177_v49 = vpop.xlane.xlu1 %176 }
 0x245   :  { %v227_v45 = vpop.eup %226 }
 0x246   :  { %v161_v46 = vmul.f32 0.6931472, %v227_v45  ;;  %v229_v54 = vpop.eup %228 }
 0x247   :  { %v163_v59 = vmul.f32 0.6931472, %v229_v54 }
 0x248   :  { %v164_v47 = vadd.f32 %v161_v46, %v108_v17 }
 0x249   :  { %v165_v1 = vadd.f32 %v163_v59, %v298_v20 }
 0x24a   :  { %v180_v50 = vsub.f32 %v164_v47, %v177_v49 }
 0x24c   :  { %v182_v51 = vmul.f32 %v180_v50, %v148_v48 }
 0x24e   :  { %184 = vst.msk [vmem:[%s337_s7] sm:$0xff] %vm143_vm10, %v182_v51 }
 0x291   :  { %v124_v55 = vpop.xlane.xlu1 %123 }
 0x292   :  { %v125_v58 = vcvt.f32.s32 %v124_v55 }
 0x294   :  { %v128_v60 = vadd.s32 %v127_v56, %v125_v58 }
 0x295   :  { %v138_v61 = vpop.xlane.xlu1 %137 }
 0x296   :  { %144 = vst.msk [vmem:[%s338_s6] sm:$0xff] %vm143_vm10, %v128_v60  ;;  %v139_v63 = vcvt.f32.s32 %v138_v61 }
 0x298   :  { %v142_v0 = vadd.s32 %v141_v62, %v139_v63 }
 0x299   :  { %v179_v3 = vpop.xlane.xlu1 %178 }
 0x29a   :  { %145 = vst.msk [vmem:[%s338_s6 + $0x8] sm:$0xff] %vm143_vm10, %v142_v0  ;;  %v181_v4 = vsub.f32 %v165_v1, %v179_v3 }
 0x29c   :  { %v183_v5 = vmul.f32 %v181_v4, %v149_v2 }
 0x29e   :  { %185 = vst.msk [vmem:[%s337_s7 + $0x8] sm:$0xff] %vm143_vm10, %v183_v5 }

</bundles_post_ra>
